<compile_context>
chip_gen: v5e
topology: v5e:2x2
jax: 0.10.0
libtpu: 0.0.40
codegen_flags: <defaults>
</compile_context>

<pallas_src>
import functools

import jax
import jax.numpy as jnp
from jax import lax
from jax.experimental import pallas as pl
from jax.experimental.pallas import tpu as pltpu

LANE = 128


def _mcpbrnn_kernel(x_ref, params_ref, out_ref, *, B, T, time_lag):
    # x_ref:      (B*T,)    f32 SMEM   flattened, x[b, t] = x_ref[b*T + t]
    # params_ref: (3,)      f32 SMEM   [s, a1, a0]; gate oo = s*tanh(a1*c+a0)+s
    # out_ref:    (Bp, 128) f32 VMEM   packed per-batch row:
    #             lane0 = h_n, lane1 = c_n, lane2 = Gate_oo, lane3 = Gate_f
    # Rows b < time_lag (and padded rows b >= B) stay zero, like torch.zeros.
    out_ref[...] = jnp.zeros_like(out_ref)

    sv = jnp.full((1, LANE), params_ref[0], jnp.float32)
    a1v = jnp.full((1, LANE), params_ref[1], jnp.float32)
    a0v = jnp.full((1, LANE), params_ref[2], jnp.float32)
    one_minus_s = 1.0 - sv

    # Hoisted lane masks (JAX does not CSE broadcast_in_dim inside loops).
    lane = lax.broadcasted_iota(jnp.int32, (1, LANE), 1)
    l0 = lane == 0
    l1 = lane == 1
    l2 = lane == 2

    def b_body(b, c_state):
        def t_body(t, carry):
            c_in, _ = carry
            # Scalar SMEM load, broadcast off the critical path.
            u1 = jnp.full((1, LANE), x_ref[b * T + t], jnp.float32)
            # c_new = (1 - oo)*c + u1 with oo = s*tanh(a1*c + a0) + s,
            # refactored so only {mul, sub} follow the tanh serially.
            pre = one_minus_s * c_in + u1      # independent of tanh
            sc = sv * c_in                     # independent of tanh
            th = jnp.tanh(a1v * c_in + a0v)
            c_new = pre - sc * th
            return (c_new, c_in)

        # T is static -> fully unrolled, visible to the LLO scheduler.
        c_out, c_prev = lax.fori_loop(0, T, t_body, (c_state, c_state),
                                      unroll=True)

        # Recompute the last-step gate once per b (amortized over T steps).
        oo = sv * jnp.tanh(a1v * c_prev + a0v) + sv
        h = oo * c_prev                        # h_n[b] = oo * c_0 (pre-update)
        f = 1.0 - oo

        row = jnp.where(l0, h,
              jnp.where(l1, c_prev,
              jnp.where(l2, oo, f)))
        out_ref[pl.ds(b, 1), :] = row          # single full-lane store per b
        return c_out

    # Outer recurrence starts at time_lag (static), exactly like the torch
    # `for b in range(time_lag, batch_size)` loop; state carries across b.
    lax.fori_loop(time_lag, B, b_body, jnp.zeros((1, LANE), jnp.float32))


def mcpbrnn_sw_variant_routing(x, epoch, time_lag, y_obs, p_mean, p_std,
                               weight_r_yom, weight_r_yfm, bias_b0_yom,
                               weight_b1_yom):
    """Forward pass of MCPBRNN_SW_Variant_Routing (hidden_size = 1).

    epoch and y_obs are unused by the reference forward; kept for parity.
    Returns (h_n, c_n, Gate_oo, Gate_f), each of shape (batch, 1) float32.
    """
    del epoch, y_obs  # unused by the PyTorch forward
    x = jnp.asarray(x, jnp.float32)
    B, T = x.shape
    Bp = ((B + 7) // 8) * 8                 # sublane-pad the output slab rows
    time_lag = min(max(int(time_lag), 0), B)

    w_om = jnp.asarray(weight_r_yom, jnp.float32)[0, 0]
    w_fm = jnp.asarray(weight_r_yfm, jnp.float32)[0, 0]
    b0 = jnp.asarray(bias_b0_yom, jnp.float32)[0]
    w_b1 = jnp.asarray(weight_b1_yom, jnp.float32)[0, 0]
    p_mean = jnp.float32(p_mean)
    p_std = jnp.float32(p_std)

    # Parameter-only math folded out of the serial per-step chain.
    e_om = jnp.exp(w_om)
    e_fm = jnp.exp(w_fm)
    oo1 = e_om / (e_om + e_fm)
    k1 = w_b1 / p_std
    k0 = b0 - p_mean * k1
    # sigmoid(x) = 0.5*tanh(0.5*x) + 0.5  ->  oo = s*tanh(a1*c + a0) + s
    s = 0.5 * oo1
    a1 = 0.5 * k1
    a0 = 0.5 * k0
    params = jnp.stack([s, a1, a0]).astype(jnp.float32)

    kernel = functools.partial(_mcpbrnn_kernel, B=B, T=T, time_lag=time_lag)

    smem = pl.BlockSpec(memory_space=pltpu.MemorySpace.SMEM)
    vmem = pl.BlockSpec(memory_space=pltpu.MemorySpace.VMEM)

    out = pl.pallas_call(
        kernel,
        out_shape=jax.ShapeDtypeStruct((Bp, LANE), jnp.float32),
        in_specs=[smem, smem],
        out_specs=vmem,
    )(x.reshape(-1), params)

    h_n = out[:B, 0:1]
    c_n = out[:B, 1:2]
    g_oo = out[:B, 2:3]
    g_f = out[:B, 3:4]
    return h_n, c_n, g_oo, g_f


def _reference(x, time_lag, p_mean, p_std, w_om, w_fm, b0, w_b1):
    """Pure-Python reference mirroring the PyTorch loops exactly."""
    import math
    import numpy as np
    B, T = x.shape
    h_n = [0.0] * B
    c_n = [0.0] * B
    goo = [0.0] * B
    gf = [0.0] * B
    c = 0.0
    w_om = float(w_om[0, 0]); w_fm = float(w_fm[0, 0])
    b0 = float(b0[0]); w_b1 = float(w_b1[0, 0])
    oo1 = math.exp(w_om) / (math.exp(w_om) + math.exp(w_fm))
    xs = jax.device_get(x)
    for b in range(time_lag, B):
        for t in range(T):
            c0 = c
            u1 = float(xs[b, t])
            oo2 = b0 + ((c0 - p_mean) / p_std) * w_b1
            oo = oo1 * (1.0 / (1.0 + math.exp(-oo2)))
            f = 1.0 - oo
            c = f * c0 + u1
            h_n[b] = oo * c0
            c_n[b] = c0
            goo[b] = oo
            gf[b] = f
    mk = lambda v: np.asarray(v, dtype=np.float32).reshape(B, 1)
    return mk(h_n), mk(c_n), mk(goo), mk(gf)


if __name__ == "__main__":
    key = jax.random.PRNGKey(0)
    k1, k2, k3, k4, k5 = jax.random.split(key, 5)

    hidden_size = 1
    # Deterministic parameter init (mirrors torch.rand uniform [0, 1) shapes)
    weight_r_yom = jax.random.uniform(k1, (hidden_size, hidden_size), jnp.float32)
    weight_r_yfm = jax.random.uniform(k2, (hidden_size, hidden_size), jnp.float32)
    bias_b0_yom = jax.random.uniform(k3, (hidden_size,), jnp.float32)
    weight_b1_yom = jax.random.uniform(k4, (hidden_size, hidden_size), jnp.float32)

    B, T = 8, 8          # batch (outer recurrence dim), seq
    x = jax.random.uniform(k5, (B, T), jnp.float32)
    epoch = 0
    time_lag = 2
    y_obs = jnp.zeros((B, 1), jnp.float32)  # unused by forward
    p_mean = 0.5
    p_std = 1.5

    outs = mcpbrnn_sw_variant_routing(
        x, epoch, time_lag, y_obs, p_mean, p_std,
        weight_r_yom, weight_r_yfm, bias_b0_yom, weight_b1_yom)
    outs = jax.block_until_ready(outs)

    # Silent correctness check against a pure-Python reference (full-precision
    # tanh-based sigmoid -> tight tolerance).
    refs = _reference(x, time_lag, p_mean, p_std,
                      weight_r_yom, weight_r_yfm, bias_b0_yom, weight_b1_yom)
    import numpy as np
    for got, want in zip(outs, refs):
        np.testing.assert_allclose(np.asarray(got), want, rtol=1e-3, atol=1e-3)

    print("KERNEL_OK")
</pallas_src>

<mosaic_0001>
module attributes {stable_mosaic.version = 11 : i64} {
  func.func @_mcpbrnn_kernel(%arg0: memref<64xf32, #tpu.memory_space<smem>>, %arg1: memref<3xf32, #tpu.memory_space<smem>>, %arg2: memref<8x128xf32, #tpu.memory_space<vmem>>) attributes {dimension_semantics = [], scalar_prefetch = 0 : i64, scratch_operands = 0 : i64, tpu.core_type = #tpu.core_type<tc>} {
    %cst = arith.constant 0.000000e+00 : f32
    %0 = vector.broadcast %cst : f32 to vector<8x128xf32>
    %c0 = arith.constant 0 : index
    %c0_0 = arith.constant 0 : index
    %1 = vector.load %arg2[%c0, %c0_0] : memref<8x128xf32, #tpu.memory_space<vmem>>, vector<8x128xf32>
    tpu.vector_store %arg2[%c0, %c0_0], %0 {strides = array<i32>} : memref<8x128xf32, #tpu.memory_space<vmem>>, vector<8x128xf32>,
    %c0_1 = arith.constant 0 : index
    %2 = memref.load %arg1[%c0_1] : memref<3xf32, #tpu.memory_space<smem>>
    %3 = vector.broadcast %2 : f32 to vector<1x128xf32>
    %c1 = arith.constant 1 : index
    %4 = memref.load %arg1[%c1] : memref<3xf32, #tpu.memory_space<smem>>
    %5 = vector.broadcast %4 : f32 to vector<1x128xf32>
    %c2 = arith.constant 2 : index
    %6 = memref.load %arg1[%c2] : memref<3xf32, #tpu.memory_space<smem>>
    %7 = vector.broadcast %6 : f32 to vector<1x128xf32>
    %cst_2 = arith.constant 1.000000e+00 : f32
    %8 = vector.broadcast %cst_2 : f32 to vector<1x128xf32>
    %9 = arith.subf %8, %3 : vector<1x128xf32>
    %10 = tpu.iota {dimensions = array<i32: 1>} : vector<1x128xi32>
    %c0_i32 = arith.constant 0 : i32
    %11 = vector.broadcast %c0_i32 : i32 to vector<1x128xi32>
    %12 = arith.cmpi eq, %10, %11 : vector<1x128xi32>
    %c1_i32 = arith.constant 1 : i32
    %13 = vector.broadcast %c1_i32 : i32 to vector<1x128xi32>
    %14 = arith.cmpi eq, %10, %13 : vector<1x128xi32>
    %c2_i32 = arith.constant 2 : i32
    %15 = vector.broadcast %c2_i32 : i32 to vector<1x128xi32>
    %16 = arith.cmpi eq, %10, %15 : vector<1x128xi32>
    %cst_3 = arith.constant 0.000000e+00 : f32
    %17 = vector.broadcast %cst_3 : f32 to vector<1x128xf32>
    %c2_i32_4 = arith.constant 2 : i32
    %c6_i32 = arith.constant 6 : i32
    %18 = arith.addi %c2_i32_4, %c6_i32 : i32
    %c1_i32_5 = arith.constant 1 : i32
    %19 = scf.for %arg3 = %c2_i32_4 to %18 step %c1_i32_5 iter_args(%arg4 = %17) -> (vector<1x128xf32>)  : i32 {
      %c0_i32_7 = arith.constant 0 : i32
      %c8_i32 = arith.constant 8 : i32
      %20 = arith.muli %arg3, %c8_i32 : i32
      %21 = arith.addi %20, %c0_i32_7 : i32
      %22 = arith.index_cast %21 : i32 to index
      %23 = memref.load %arg0[%22] : memref<64xf32, #tpu.memory_space<smem>>
      %24 = vector.broadcast %23 : f32 to vector<1x128xf32>
      %25 = arith.mulf %9, %arg4 : vector<1x128xf32>
      %26 = arith.addf %25, %24 : vector<1x128xf32>
      %27 = arith.mulf %3, %arg4 : vector<1x128xf32>
      %28 = arith.mulf %5, %arg4 : vector<1x128xf32>
      %29 = arith.addf %28, %7 : vector<1x128xf32>
      %30 = math.tanh %29 : vector<1x128xf32>
      %31 = arith.mulf %27, %30 : vector<1x128xf32>
      %32 = arith.subf %26, %31 : vector<1x128xf32>
      %c1_i32_8 = arith.constant 1 : i32
      %c8_i32_9 = arith.constant 8 : i32
      %33 = arith.muli %arg3, %c8_i32_9 : i32
      %34 = arith.addi %33, %c1_i32_8 : i32
      %35 = arith.index_cast %34 : i32 to index
      %36 = memref.load %arg0[%35] : memref<64xf32, #tpu.memory_space<smem>>
      %37 = vector.broadcast %36 : f32 to vector<1x128xf32>
      %38 = arith.mulf %9, %32 : vector<1x128xf32>
      %39 = arith.addf %38, %37 : vector<1x128xf32>
      %40 = arith.mulf %3, %32 : vector<1x128xf32>
      %41 = arith.mulf %5, %32 : vector<1x128xf32>
      %42 = arith.addf %41, %7 : vector<1x128xf32>
      %43 = math.tanh %42 : vector<1x128xf32>
      %44 = arith.mulf %40, %43 : vector<1x128xf32>
      %45 = arith.subf %39, %44 : vector<1x128xf32>
      %c2_i32_10 = arith.constant 2 : i32
      %c8_i32_11 = arith.constant 8 : i32
      %46 = arith.muli %arg3, %c8_i32_11 : i32
      %47 = arith.addi %46, %c2_i32_10 : i32
      %48 = arith.index_cast %47 : i32 to index
      %49 = memref.load %arg0[%48] : memref<64xf32, #tpu.memory_space<smem>>
      %50 = vector.broadcast %49 : f32 to vector<1x128xf32>
      %51 = arith.mulf %9, %45 : vector<1x128xf32>
      %52 = arith.addf %51, %50 : vector<1x128xf32>
      %53 = arith.mulf %3, %45 : vector<1x128xf32>
      %54 = arith.mulf %5, %45 : vector<1x128xf32>
      %55 = arith.addf %54, %7 : vector<1x128xf32>
      %56 = math.tanh %55 : vector<1x128xf32>
      %57 = arith.mulf %53, %56 : vector<1x128xf32>
      %58 = arith.subf %52, %57 : vector<1x128xf32>
      %c3_i32 = arith.constant 3 : i32
      %c8_i32_12 = arith.constant 8 : i32
      %59 = arith.muli %arg3, %c8_i32_12 : i32
      %60 = arith.addi %59, %c3_i32 : i32
      %61 = arith.index_cast %60 : i32 to index
      %62 = memref.load %arg0[%61] : memref<64xf32, #tpu.memory_space<smem>>
      %63 = vector.broadcast %62 : f32 to vector<1x128xf32>
      %64 = arith.mulf %9, %58 : vector<1x128xf32>
      %65 = arith.addf %64, %63 : vector<1x128xf32>
      %66 = arith.mulf %3, %58 : vector<1x128xf32>
      %67 = arith.mulf %5, %58 : vector<1x128xf32>
      %68 = arith.addf %67, %7 : vector<1x128xf32>
      %69 = math.tanh %68 : vector<1x128xf32>
      %70 = arith.mulf %66, %69 : vector<1x128xf32>
      %71 = arith.subf %65, %70 : vector<1x128xf32>
      %c4_i32 = arith.constant 4 : i32
      %c8_i32_13 = arith.constant 8 : i32
      %72 = arith.muli %arg3, %c8_i32_13 : i32
      %73 = arith.addi %72, %c4_i32 : i32
      %74 = arith.index_cast %73 : i32 to index
      %75 = memref.load %arg0[%74] : memref<64xf32, #tpu.memory_space<smem>>
      %76 = vector.broadcast %75 : f32 to vector<1x128xf32>
      %77 = arith.mulf %9, %71 : vector<1x128xf32>
      %78 = arith.addf %77, %76 : vector<1x128xf32>
      %79 = arith.mulf %3, %71 : vector<1x128xf32>
      %80 = arith.mulf %5, %71 : vector<1x128xf32>
      %81 = arith.addf %80, %7 : vector<1x128xf32>
      %82 = math.tanh %81 : vector<1x128xf32>
      %83 = arith.mulf %79, %82 : vector<1x128xf32>
      %84 = arith.subf %78, %83 : vector<1x128xf32>
      %c5_i32 = arith.constant 5 : i32
      %c8_i32_14 = arith.constant 8 : i32
      %85 = arith.muli %arg3, %c8_i32_14 : i32
      %86 = arith.addi %85, %c5_i32 : i32
      %87 = arith.index_cast %86 : i32 to index
      %88 = memref.load %arg0[%87] : memref<64xf32, #tpu.memory_space<smem>>
      %89 = vector.broadcast %88 : f32 to vector<1x128xf32>
      %90 = arith.mulf %9, %84 : vector<1x128xf32>
      %91 = arith.addf %90, %89 : vector<1x128xf32>
      %92 = arith.mulf %3, %84 : vector<1x128xf32>
      %93 = arith.mulf %5, %84 : vector<1x128xf32>
      %94 = arith.addf %93, %7 : vector<1x128xf32>
      %95 = math.tanh %94 : vector<1x128xf32>
      %96 = arith.mulf %92, %95 : vector<1x128xf32>
      %97 = arith.subf %91, %96 : vector<1x128xf32>
      %c6_i32_15 = arith.constant 6 : i32
      %c8_i32_16 = arith.constant 8 : i32
      %98 = arith.muli %arg3, %c8_i32_16 : i32
      %99 = arith.addi %98, %c6_i32_15 : i32
      %100 = arith.index_cast %99 : i32 to index
      %101 = memref.load %arg0[%100] : memref<64xf32, #tpu.memory_space<smem>>
      %102 = vector.broadcast %101 : f32 to vector<1x128xf32>
      %103 = arith.mulf %9, %97 : vector<1x128xf32>
      %104 = arith.addf %103, %102 : vector<1x128xf32>
      %105 = arith.mulf %3, %97 : vector<1x128xf32>
      %106 = arith.mulf %5, %97 : vector<1x128xf32>
      %107 = arith.addf %106, %7 : vector<1x128xf32>
      %108 = math.tanh %107 : vector<1x128xf32>
      %109 = arith.mulf %105, %108 : vector<1x128xf32>
      %110 = arith.subf %104, %109 : vector<1x128xf32>
      %c7_i32 = arith.constant 7 : i32
      %c8_i32_17 = arith.constant 8 : i32
      %111 = arith.muli %arg3, %c8_i32_17 : i32
      %112 = arith.addi %111, %c7_i32 : i32
      %113 = arith.index_cast %112 : i32 to index
      %114 = memref.load %arg0[%113] : memref<64xf32, #tpu.memory_space<smem>>
      %115 = vector.broadcast %114 : f32 to vector<1x128xf32>
      %116 = arith.mulf %9, %110 : vector<1x128xf32>
      %117 = arith.addf %116, %115 : vector<1x128xf32>
      %118 = arith.mulf %3, %110 : vector<1x128xf32>
      %119 = arith.mulf %5, %110 : vector<1x128xf32>
      %120 = arith.addf %119, %7 : vector<1x128xf32>
      %121 = math.tanh %120 : vector<1x128xf32>
      %122 = arith.mulf %118, %121 : vector<1x128xf32>
      %123 = arith.subf %117, %122 : vector<1x128xf32>
      %c8_i32_18 = arith.constant 8 : i32
      %124 = arith.mulf %5, %110 : vector<1x128xf32>
      %125 = arith.addf %124, %7 : vector<1x128xf32>
      %126 = math.tanh %125 : vector<1x128xf32>
      %127 = arith.mulf %3, %126 : vector<1x128xf32>
      %128 = arith.addf %127, %3 : vector<1x128xf32>
      %129 = arith.mulf %128, %110 : vector<1x128xf32>
      %cst_19 = arith.constant 1.000000e+00 : f32
      %130 = vector.broadcast %cst_19 : f32 to vector<1x128xf32>
      %131 = arith.subf %130, %128 : vector<1x128xf32>
      %132 = arith.select %16, %128, %131 : vector<1x128xi1>, vector<1x128xf32>
      %133 = arith.select %14, %110, %132 : vector<1x128xi1>, vector<1x128xf32>
      %134 = arith.select %12, %129, %133 : vector<1x128xi1>, vector<1x128xf32>
      %135 = arith.index_cast %arg3 : i32 to index
      %c0_20 = arith.constant 0 : index
      %136 = vector.load %arg2[%135, %c0_20] : memref<8x128xf32, #tpu.memory_space<vmem>>, vector<1x128xf32>
      tpu.vector_store %arg2[%135, %c0_20], %134 {strides = array<i32>} : memref<8x128xf32, #tpu.memory_space<vmem>>, vector<1x128xf32>,
      scf.yield %123 : vector<1x128xf32>
    }
    %c6_i32_6 = arith.constant 6 : i32
    return
  }
}

</mosaic_0001>

<bundles_post_ra>
// kernel: tpu_custom_call.1
= control target key start
LH: loop header
LB: loop body
LE: loop exit
PB: predicated region body
PF: predicated region fallthrough
CT: control target
= control target key end

     0   :  { %7 = vsyncpa [#allocation4], 0  ;;  %s397_s0 = inlined_call_operand.hbm [shape: f32[64], index: 0, kind: input, shape index: {}]   ;;  %s398_s1 = inlined_call_operand.hbm [shape: f32[3], index: 1, kind: input, shape index: {}]   ;;  %s399_s2 = inlined_call_operand.hbm [shape: f32[8,128], index: 2, kind: output, shape index: {}]  }
   0x1   :  { %8 = vsyncpa [#allocation6], 0 }
   0x2   :  { %9 = vsyncpa [#allocation3], 0  ;;  %s15_s11 = sshll.u32 %s397_s0, 4  ;;  %s24_s14 = sshll.u32 %s398_s1, 4  ;;  %s16_s11 = int_to_ptr.hbm [resolvable:$true] %s15_s11  ;;  %s25_s14 = int_to_ptr.hbm [resolvable:$true] %s24_s14 }
   0x3   :  { %s290_s15 = smov [#allocation2]   ;;  %s291_s16 = smov [#allocation5]  }
   0x4   :  { %18 = dma.hbm_to_smem %s16_s11, 16, %s290_s15, [#allocation4]  }
   0x5   :  { %27 = dma.hbm_to_smem %s25_s14, 16, %s291_s16, [#allocation6]  }
   0x6   :  { %276 = dma.done.wait [#allocation4], 16  }
   0x7   :  { %277 = vsyncadd [#allocation4], 4294967280 }
   0x8   :  { %278 = dma.done.wait [#allocation6], 16  }
   0x9   :  { %279 = vsyncadd [#allocation6], 4294967280 }
   0xa   :  { %36 = sfence }
   0xb   :  { %s38_s17 = sld [smem:[#allocation5]]  ;;  %v45_v0 = vlaneseq  ;;  %v292_v1 = vmov 0.0   ;;  %v329_v7 = vmov 0.0   ;;  %s331_s1 = smov 2  }
   0xc   :  { %37 = vst [vmem:[#allocation7] sm:$0xff] %v292_v1  ;;  %s181_s0 = sld [smem:[#allocation5 + $0x1]] }
   0xd   :  { %s182_s18 = sld [smem:[#allocation5 + $0x2]]  ;;  %v315_v2 = vand.u32 127, %v45_v0 }
   0xf   :  { %vm47_vm0 = vcmp.eq.s32.totalorder %v315_v2, 0  ;;  %vm48_vm1 = vcmp.eq.s32.totalorder %v315_v2, 1  ;;  %vm49_vm2 = vcmp.eq.s32.totalorder %v315_v2, 2 }
  0x11   :  { %v320_v3 = vstv %s38_s17 }
  0x12   :  { %v322_v4 = vstv %s181_s0  ;;  %v325_v5 = vsub.f32 1.0, %v320_v3 }
  0x13   :  { %v327_v6 = vstv %s182_s18 }
  0x14 LB: > { %s338_s19 = sshll.u32 %s288_s1, 3  ;;  %v63_v8 = vmul.f32 %v284_v7, %v322_v4  ;;  %v60_v10 = vmul.f32 %v284_v7, %v325_v5  ;;  %v62_v12 = vmul.f32 %v284_v7, %v320_v3  ;;  %s152_s7 = scalar_lea.vmem [#allocation7], %s288_s1  ;;  %s288_s1 = sphi %s331_s1, %s55_s1   ;;  %v284_v7 = vphi %v329_v7, %v144_v7  }
  0x15   : > { %s58_s20 = sld [smem:[#allocation2 + %s338_s19]]  ;;  %s68_s21 = sadd.s32 1, %s338_s19 }
  0x16   : > { %v64_v9 = vadd.f32 %v63_v8, %v327_v6  ;;  %s69_s22 = sld [smem:[#allocation2 + %s68_s21]]  ;;  %s79_s23 = sadd.s32 2, %s338_s19 }
  0x17   : > { %s80_s24 = sld [smem:[#allocation2 + %s79_s23]]  ;;  %s90_s25 = sadd.s32 3, %s338_s19 }
  0x18   : > { %204 = vtanh.f32 %v64_v9  ;;  %s91_s26 = sld [smem:[#allocation2 + %s90_s25]]  ;;  %s101_s27 = sadd.s32 4, %s338_s19 }
  0x19   : > { %s102_s28 = sld [smem:[#allocation2 + %s101_s27]]  ;;  %s112_s29 = sadd.s32 5, %s338_s19 }
  0x1a   : > { %s113_s30 = sld [smem:[#allocation2 + %s112_s29]]  ;;  %s123_s3 = sadd.s32 6, %s338_s19 }
  0x1b   : > { %v59_v11 = vstv %s58_s20  ;;  %s124_s4 = sld [smem:[#allocation2 + %s123_s3]]  ;;  %s134_s5 = sadd.s32 7, %s338_s19 }
  0x1c   : > { %v61_v13 = vadd.f32 %v60_v10, %v59_v11  ;;  %v70_v20 = vstv %s69_s22  ;;  %s135_s6 = sld [smem:[#allocation2 + %s134_s5]]  ;;  %s55_s1 = sadd.s32 1, %s288_s1  }
  0x1d   : > { %v81_v29 = vstv %s80_s24  ;;  %p52_p0 = scmp.ge.s32.totalorder %s55_s1, 8  }
  0x1e   : > { %v205_v14 = vpop.eup %204  ;;  %v92_v38 = vstv %s91_s26  ;;  %s161_s10 = sshll.u32 (%p52_p0), %s399_s2, 4  ;;  %s293_s11 = smov (%p52_p0), [#allocation7]   ;;  %s162_s10 = int_to_ptr.hbm [resolvable:$true] %s161_s10 }
  0x1f   : > { %v66_v15 = vmul.f32 %v205_v14, %v62_v12  ;;  %v103_v47 = vstv %s102_s28  ;;  %s159_s12 = sshll.u32 (%p52_p0), %s293_s11, 4  ;;  %s160_s12 = int_to_ptr.vmem [resolvable:$true] %s159_s12 }
  0x20   : > { %v114_v56 = vstv %s113_s30 }
  0x21   : > { %v67_v16 = vsub.f32 %v61_v13, %v66_v15  ;;  %v125_v1 = vstv %s124_s4 }
  0x22   : > { %v136_v15 = vstv %s135_s6 }
  0x23   : > { %v74_v17 = vmul.f32 %v67_v16, %v322_v4  ;;  %v71_v19 = vmul.f32 %v67_v16, %v325_v5  ;;  %v73_v21 = vmul.f32 %v67_v16, %v320_v3 }
  0x25   : > { %v75_v18 = vadd.f32 %v74_v17, %v327_v6  ;;  %v72_v22 = vadd.f32 %v71_v19, %v70_v20 }
  0x27   : > { %206 = vtanh.f32 %v75_v18 }
  0x2d   : > { %v207_v23 = vpop.eup %206 }
  0x2e   : > { %v77_v24 = vmul.f32 %v207_v23, %v73_v21 }
  0x30   : > { %v78_v25 = vsub.f32 %v72_v22, %v77_v24 }
  0x32   : > { %v85_v26 = vmul.f32 %v78_v25, %v322_v4  ;;  %v82_v28 = vmul.f32 %v78_v25, %v325_v5  ;;  %v84_v30 = vmul.f32 %v78_v25, %v320_v3 }
  0x34   : > { %v86_v27 = vadd.f32 %v85_v26, %v327_v6  ;;  %v83_v31 = vadd.f32 %v82_v28, %v81_v29 }
  0x36   : > { %208 = vtanh.f32 %v86_v27 }
  0x3c   : > { %v209_v32 = vpop.eup %208 }
  0x3d   : > { %v88_v33 = vmul.f32 %v209_v32, %v84_v30 }
  0x3f   : > { %v89_v34 = vsub.f32 %v83_v31, %v88_v33 }
  0x41   : > { %v96_v35 = vmul.f32 %v89_v34, %v322_v4  ;;  %v93_v37 = vmul.f32 %v89_v34, %v325_v5  ;;  %v95_v39 = vmul.f32 %v89_v34, %v320_v3 }
  0x43   : > { %v97_v36 = vadd.f32 %v96_v35, %v327_v6  ;;  %v94_v40 = vadd.f32 %v93_v37, %v92_v38 }
  0x45   : > { %210 = vtanh.f32 %v97_v36 }
  0x4b   : > { %v211_v41 = vpop.eup %210 }
  0x4c   : > { %v99_v42 = vmul.f32 %v211_v41, %v95_v39 }
  0x4e   : > { %v100_v43 = vsub.f32 %v94_v40, %v99_v42 }
  0x50   : > { %v107_v44 = vmul.f32 %v100_v43, %v322_v4  ;;  %v104_v46 = vmul.f32 %v100_v43, %v325_v5  ;;  %v106_v48 = vmul.f32 %v100_v43, %v320_v3 }
  0x52   : > { %v108_v45 = vadd.f32 %v107_v44, %v327_v6  ;;  %v105_v49 = vadd.f32 %v104_v46, %v103_v47 }
  0x54   : > { %212 = vtanh.f32 %v108_v45 }
  0x5a   : > { %v213_v50 = vpop.eup %212 }
  0x5b   : > { %v110_v51 = vmul.f32 %v213_v50, %v106_v48 }
  0x5d   : > { %v111_v52 = vsub.f32 %v105_v49, %v110_v51 }
  0x5f   : > { %v118_v53 = vmul.f32 %v111_v52, %v322_v4  ;;  %v115_v55 = vmul.f32 %v111_v52, %v325_v5  ;;  %v117_v57 = vmul.f32 %v111_v52, %v320_v3 }
  0x61   : > { %v119_v54 = vadd.f32 %v118_v53, %v327_v6  ;;  %v116_v58 = vadd.f32 %v115_v55, %v114_v56 }
  0x63   : > { %214 = vtanh.f32 %v119_v54 }
  0x69   : > { %v215_v59 = vpop.eup %214 }
  0x6a   : > { %v121_v60 = vmul.f32 %v215_v59, %v117_v57 }
  0x6c   : > { %v122_v61 = vsub.f32 %v116_v58, %v121_v60 }
  0x6e   : > { %v129_v62 = vmul.f32 %v122_v61, %v322_v4  ;;  %v126_v0 = vmul.f32 %v122_v61, %v325_v5  ;;  %v128_v7 = vmul.f32 %v122_v61, %v320_v3 }
  0x70   : > { %v130_v63 = vadd.f32 %v129_v62, %v327_v6  ;;  %v127_v8 = vadd.f32 %v126_v0, %v125_v1 }
  0x72   : > { %216 = vtanh.f32 %v130_v63 }
  0x78   : > { %v217_v9 = vpop.eup %216 }
  0x79   : > { %v132_v10 = vmul.f32 %v217_v9, %v128_v7 }
  0x7b   : > { %v133_v11 = vsub.f32 %v127_v8, %v132_v10 }
  0x7d   : > { %v140_v12 = vmul.f32 %v133_v11, %v322_v4  ;;  %v137_v14 = vmul.f32 %v133_v11, %v325_v5  ;;  %v139_v16 = vmul.f32 %v133_v11, %v320_v3 }
  0x7f   : > { %v141_v13 = vadd.f32 %v140_v12, %v327_v6  ;;  %v138_v17 = vadd.f32 %v137_v14, %v136_v15 }
  0x81   : > { %218 = vtanh.f32 %v141_v13 }
  0x87   : > { %v219_v18 = vpop.eup %218 }
  0x88   : > { %v143_v19 = vmul.f32 %v219_v18, %v139_v16  ;;  %v145_v20 = vmul.f32 %v219_v18, %v320_v3 }
  0x8a   : > { %v144_v7 = vsub.f32 %v138_v17, %v143_v19   ;;  %v146_v21 = vadd.f32 %v145_v20, %v320_v3 }
  0x8c   : > { %v147_v22 = vmul.f32 %v146_v21, %v133_v11  ;;  %v148_v23 = vsub.f32 1.0, %v146_v21 }
  0x8d   :  { %54 = sbr.rel (!%p52_p0) target bundleno = 20 (0x14), region = 44 }
  0x8e   : > { %v149_v24 = vsel %vm49_vm2, %v146_v21, %v148_v23 }
  0x8f   : > { %v150_v25 = vsel %vm48_vm1, %v133_v11, %v149_v24 }
  0x90   : > { %v151_v26 = vsel %vm47_vm0, %v147_v22, %v150_v25 }
  0x91   : > { %153 = vst [vmem:[%s152_s7] sm:$0x1] %v151_v26 }
  0x92   :  { %164 = dma.vmem_to_hbm [thread:$0]  %s160_s12, 128, %s162_s10, [#allocation3]  }
  0x93   :  { %280 = dma.done.wait [#allocation3], 128  }
  0x94   :  { %281 = vsyncadd [#allocation3], 4294967168 }
  0x95   :  { %169 = vsyncpa [#allocation3], 1 }
  0x96   :  { %170 = vsyncpa [#allocation4], 1 }
  0x97   :  { %171 = vsyncpa [#allocation6], 1 }

</bundles_post_ra>
